<compile_context>
chip_gen: v7x
topology: tpu7x:2x2x1
jax: 0.10.0
libtpu: 0.0.40
codegen_flags: <defaults>
</compile_context>

<pallas_src>
import jax
import jax.numpy as jnp
from jax.experimental import pallas as pl
from jax.experimental.pallas import tpu as pltpu


def _w2v_kernel(ids_ref, embed_ref, w_ref, b_ref, o_ref, e_scratch):
    # ids_ref:   (seq,)        int32, SMEM  -- token ids of X[0]
    # embed_ref: (voc, 1, emb) f32,   VMEM  -- embedding table (row-gather layout)
    # w_ref:     (emb, out)    bf16,  VMEM  -- U weight (transpose of torch's (out, emb))
    # b_ref:     (1, out)      f32,   VMEM  -- U bias
    # o_ref:     (1, out)      f32,   VMEM  -- result
    # e_scratch: (seq, emb)    f32,   VMEM  -- gathered embeddings
    seq = e_scratch.shape[0]

    # Fused embedding gather: dynamic index on the untiled leading axis.
    for i in range(seq):                     # static unroll; seq is tiny
        tok = ids_ref[i]
        e_scratch[pl.ds(i, 1), :] = embed_ref[tok]        # (1, emb)

    # U(E) on the MXU: bf16 operands, f32 accumulate.
    z = jnp.dot(e_scratch[...].astype(jnp.bfloat16), w_ref[...],
                preferred_element_type=jnp.float32)
    z = z + b_ref[...]                       # bias broadcast over seq rows

    # sigmoid = 1 / (1 + exp(-z)); exp and reciprocal both routed to the EUP.
    s = pl.reciprocal(1.0 + jnp.exp(-z), approx=True)

    # mean over the sequence axis (== sum(res) / out.size()[1] in the torch code)
    o_ref[...] = jnp.mean(s, axis=0, keepdims=True)


def word2vec_forward(X, embed_table, U_w, U_b):
    """X: (batch, seq) int token ids; embed_table: (voc, emb) f32;
    U_w: (emb, out) f32 (transpose of torch's (out, emb)); U_b: (out,) f32.
    Returns (out,) f32 = mean_i sigmoid(embed_table[X[0, i]] @ U_w + U_b)."""
    seq = X.shape[1]
    voc, emb = embed_table.shape
    out = U_w.shape[1]

    ids = X[0].astype(jnp.int32)                       # (seq,)
    embed3 = embed_table.reshape(voc, 1, emb)          # per-row tiles for the gather
    w_bf16 = U_w.astype(jnp.bfloat16)                  # bf16 MXU operand
    b2 = U_b.reshape(1, out).astype(jnp.float32)

    res = pl.pallas_call(
        _w2v_kernel,
        out_shape=jax.ShapeDtypeStruct((1, out), jnp.float32),
        in_specs=[
            pl.BlockSpec(memory_space=pltpu.MemorySpace.SMEM),   # token ids
            pl.BlockSpec(memory_space=pltpu.MemorySpace.VMEM),   # embedding table
            pl.BlockSpec(memory_space=pltpu.MemorySpace.VMEM),   # U weight (bf16)
            pl.BlockSpec(memory_space=pltpu.MemorySpace.VMEM),   # U bias
        ],
        out_specs=pl.BlockSpec(memory_space=pltpu.MemorySpace.VMEM),
        scratch_shapes=[pltpu.VMEM((seq, emb), jnp.float32)],
    )(ids, embed3, w_bf16, b2)
    return res[0]


if __name__ == "__main__":
    # Small, deterministic shapes consistent with the module.
    voc_size = 50
    embedding_size = 32
    out_size = 128
    batch = 2
    seq = 8

    key = jax.random.PRNGKey(0)
    k_emb, k_uw, k_ub, k_ww, k_wb, k_x = jax.random.split(key, 6)

    # Deterministic parameter init (synthetic; not loading a checkpoint).
    embed_table = jax.random.normal(k_emb, (voc_size, embedding_size), jnp.float32)
    U_w = jax.random.normal(k_uw, (embedding_size, out_size), jnp.float32) * 0.1
    U_b = jax.random.normal(k_ub, (out_size,), jnp.float32) * 0.1
    # self.W is defined in __init__ but never used in forward; kept for parity.
    W_w = jax.random.normal(k_ww, (embedding_size, out_size), jnp.float32) * 0.1  # noqa: F841
    W_b = jax.random.normal(k_wb, (out_size,), jnp.float32) * 0.1                 # noqa: F841

    X = jax.random.randint(k_x, (batch, seq), 0, voc_size, dtype=jnp.int32)

    ans = jax.block_until_ready(word2vec_forward(X, embed_table, U_w, U_b))
    assert ans.shape == (out_size,)

    # Pure-JAX references.
    E = embed_table[X[0]]                                       # (seq, emb)
    ref_f32 = jnp.mean(jax.nn.sigmoid(E @ U_w + U_b), axis=0)
    # Reference mimicking the kernel's bf16 MXU operands / f32 accumulation.
    z_bf16 = jnp.dot(E.astype(jnp.bfloat16), U_w.astype(jnp.bfloat16),
                     preferred_element_type=jnp.float32) + U_b
    ref_bf16 = jnp.mean(jax.nn.sigmoid(z_bf16), axis=0)

    assert jnp.allclose(ans, ref_bf16, atol=2e-3, rtol=2e-3), (
        float(jnp.max(jnp.abs(ans - ref_bf16))))
    assert jnp.allclose(ans, ref_f32, atol=2e-2, rtol=2e-2), (
        float(jnp.max(jnp.abs(ans - ref_f32))))

    print("KERNEL_OK")
</pallas_src>

<mosaic_0001>
module attributes {stable_mosaic.version = 11 : i64} {
  func.func @_w2v_kernel(%arg0: memref<8xi32, #tpu.memory_space<smem>>, %arg1: memref<50x1x32xf32, #tpu.memory_space<vmem>>, %arg2: memref<32x128xbf16, #tpu.memory_space<vmem>>, %arg3: memref<1x128xf32, #tpu.memory_space<vmem>>, %arg4: memref<1x128xf32, #tpu.memory_space<vmem>>, %arg5: memref<8x32xf32, #tpu.memory_space<vmem>>) attributes {dimension_semantics = [], scalar_prefetch = 0 : i64, scratch_operands = 1 : i64, tpu.core_type = #tpu.core_type<tc>} {
    %c0 = arith.constant 0 : index
    %0 = memref.load %arg0[%c0] : memref<8xi32, #tpu.memory_space<smem>>
    %1 = arith.index_cast %0 : i32 to index
    %c0_0 = arith.constant 0 : index
    %c0_1 = arith.constant 0 : index
    %2 = vector.load %arg1[%1, %c0_0, %c0_1] : memref<50x1x32xf32, #tpu.memory_space<vmem>>, vector<1x1x32xf32>
    %3 = vector.shape_cast %2 : vector<1x1x32xf32> to vector<1x32xf32>
    %c0_2 = arith.constant 0 : index
    %c0_3 = arith.constant 0 : index
    %4 = vector.load %arg5[%c0_2, %c0_3] : memref<8x32xf32, #tpu.memory_space<vmem>>, vector<1x32xf32>
    tpu.vector_store %arg5[%c0_2, %c0_3], %3 {strides = array<i32>} : memref<8x32xf32, #tpu.memory_space<vmem>>, vector<1x32xf32>,
    %c1 = arith.constant 1 : index
    %5 = memref.load %arg0[%c1] : memref<8xi32, #tpu.memory_space<smem>>
    %6 = arith.index_cast %5 : i32 to index
    %c0_4 = arith.constant 0 : index
    %c0_5 = arith.constant 0 : index
    %7 = vector.load %arg1[%6, %c0_4, %c0_5] : memref<50x1x32xf32, #tpu.memory_space<vmem>>, vector<1x1x32xf32>
    %8 = vector.shape_cast %7 : vector<1x1x32xf32> to vector<1x32xf32>
    %c1_6 = arith.constant 1 : index
    %c0_7 = arith.constant 0 : index
    %9 = vector.load %arg5[%c1_6, %c0_7] : memref<8x32xf32, #tpu.memory_space<vmem>>, vector<1x32xf32>
    tpu.vector_store %arg5[%c1_6, %c0_7], %8 {strides = array<i32>} : memref<8x32xf32, #tpu.memory_space<vmem>>, vector<1x32xf32>,
    %c2 = arith.constant 2 : index
    %10 = memref.load %arg0[%c2] : memref<8xi32, #tpu.memory_space<smem>>
    %11 = arith.index_cast %10 : i32 to index
    %c0_8 = arith.constant 0 : index
    %c0_9 = arith.constant 0 : index
    %12 = vector.load %arg1[%11, %c0_8, %c0_9] : memref<50x1x32xf32, #tpu.memory_space<vmem>>, vector<1x1x32xf32>
    %13 = vector.shape_cast %12 : vector<1x1x32xf32> to vector<1x32xf32>
    %c2_10 = arith.constant 2 : index
    %c0_11 = arith.constant 0 : index
    %14 = vector.load %arg5[%c2_10, %c0_11] : memref<8x32xf32, #tpu.memory_space<vmem>>, vector<1x32xf32>
    tpu.vector_store %arg5[%c2_10, %c0_11], %13 {strides = array<i32>} : memref<8x32xf32, #tpu.memory_space<vmem>>, vector<1x32xf32>,
    %c3 = arith.constant 3 : index
    %15 = memref.load %arg0[%c3] : memref<8xi32, #tpu.memory_space<smem>>
    %16 = arith.index_cast %15 : i32 to index
    %c0_12 = arith.constant 0 : index
    %c0_13 = arith.constant 0 : index
    %17 = vector.load %arg1[%16, %c0_12, %c0_13] : memref<50x1x32xf32, #tpu.memory_space<vmem>>, vector<1x1x32xf32>
    %18 = vector.shape_cast %17 : vector<1x1x32xf32> to vector<1x32xf32>
    %c3_14 = arith.constant 3 : index
    %c0_15 = arith.constant 0 : index
    %19 = vector.load %arg5[%c3_14, %c0_15] : memref<8x32xf32, #tpu.memory_space<vmem>>, vector<1x32xf32>
    tpu.vector_store %arg5[%c3_14, %c0_15], %18 {strides = array<i32>} : memref<8x32xf32, #tpu.memory_space<vmem>>, vector<1x32xf32>,
    %c4 = arith.constant 4 : index
    %20 = memref.load %arg0[%c4] : memref<8xi32, #tpu.memory_space<smem>>
    %21 = arith.index_cast %20 : i32 to index
    %c0_16 = arith.constant 0 : index
    %c0_17 = arith.constant 0 : index
    %22 = vector.load %arg1[%21, %c0_16, %c0_17] : memref<50x1x32xf32, #tpu.memory_space<vmem>>, vector<1x1x32xf32>
    %23 = vector.shape_cast %22 : vector<1x1x32xf32> to vector<1x32xf32>
    %c4_18 = arith.constant 4 : index
    %c0_19 = arith.constant 0 : index
    %24 = vector.load %arg5[%c4_18, %c0_19] : memref<8x32xf32, #tpu.memory_space<vmem>>, vector<1x32xf32>
    tpu.vector_store %arg5[%c4_18, %c0_19], %23 {strides = array<i32>} : memref<8x32xf32, #tpu.memory_space<vmem>>, vector<1x32xf32>,
    %c5 = arith.constant 5 : index
    %25 = memref.load %arg0[%c5] : memref<8xi32, #tpu.memory_space<smem>>
    %26 = arith.index_cast %25 : i32 to index
    %c0_20 = arith.constant 0 : index
    %c0_21 = arith.constant 0 : index
    %27 = vector.load %arg1[%26, %c0_20, %c0_21] : memref<50x1x32xf32, #tpu.memory_space<vmem>>, vector<1x1x32xf32>
    %28 = vector.shape_cast %27 : vector<1x1x32xf32> to vector<1x32xf32>
    %c5_22 = arith.constant 5 : index
    %c0_23 = arith.constant 0 : index
    %29 = vector.load %arg5[%c5_22, %c0_23] : memref<8x32xf32, #tpu.memory_space<vmem>>, vector<1x32xf32>
    tpu.vector_store %arg5[%c5_22, %c0_23], %28 {strides = array<i32>} : memref<8x32xf32, #tpu.memory_space<vmem>>, vector<1x32xf32>,
    %c6 = arith.constant 6 : index
    %30 = memref.load %arg0[%c6] : memref<8xi32, #tpu.memory_space<smem>>
    %31 = arith.index_cast %30 : i32 to index
    %c0_24 = arith.constant 0 : index
    %c0_25 = arith.constant 0 : index
    %32 = vector.load %arg1[%31, %c0_24, %c0_25] : memref<50x1x32xf32, #tpu.memory_space<vmem>>, vector<1x1x32xf32>
    %33 = vector.shape_cast %32 : vector<1x1x32xf32> to vector<1x32xf32>
    %c6_26 = arith.constant 6 : index
    %c0_27 = arith.constant 0 : index
    %34 = vector.load %arg5[%c6_26, %c0_27] : memref<8x32xf32, #tpu.memory_space<vmem>>, vector<1x32xf32>
    tpu.vector_store %arg5[%c6_26, %c0_27], %33 {strides = array<i32>} : memref<8x32xf32, #tpu.memory_space<vmem>>, vector<1x32xf32>,
    %c7 = arith.constant 7 : index
    %35 = memref.load %arg0[%c7] : memref<8xi32, #tpu.memory_space<smem>>
    %36 = arith.index_cast %35 : i32 to index
    %c0_28 = arith.constant 0 : index
    %c0_29 = arith.constant 0 : index
    %37 = vector.load %arg1[%36, %c0_28, %c0_29] : memref<50x1x32xf32, #tpu.memory_space<vmem>>, vector<1x1x32xf32>
    %38 = vector.shape_cast %37 : vector<1x1x32xf32> to vector<1x32xf32>
    %c7_30 = arith.constant 7 : index
    %c0_31 = arith.constant 0 : index
    %39 = vector.load %arg5[%c7_30, %c0_31] : memref<8x32xf32, #tpu.memory_space<vmem>>, vector<1x32xf32>
    tpu.vector_store %arg5[%c7_30, %c0_31], %38 {strides = array<i32>} : memref<8x32xf32, #tpu.memory_space<vmem>>, vector<1x32xf32>,
    %c0_32 = arith.constant 0 : index
    %c0_33 = arith.constant 0 : index
    %40 = vector.load %arg5[%c0_32, %c0_33] : memref<8x32xf32, #tpu.memory_space<vmem>>, vector<8x32xf32>
    %41 = arith.truncf %40 : vector<8x32xf32> to vector<8x32xbf16>
    %c0_34 = arith.constant 0 : index
    %c0_35 = arith.constant 0 : index
    %42 = vector.load %arg2[%c0_34, %c0_35] : memref<32x128xbf16, #tpu.memory_space<vmem>>, vector<32x128xbf16>
    %cst = arith.constant dense<0.000000e+00> : vector<8x128xf32>
    %43 = tpu.matmul %41, %42, %cst {dimension_numbers = #tpu.dot_dimension_numbers<[1], [0], [0], [1], [0, 0, 1, 1], [], []>} : vector<8x32xbf16>, vector<32x128xbf16>, vector<8x128xf32> -> vector<8x128xf32>
    %c0_36 = arith.constant 0 : index
    %c0_37 = arith.constant 0 : index
    %44 = vector.load %arg3[%c0_36, %c0_37] : memref<1x128xf32, #tpu.memory_space<vmem>>, vector<1x128xf32>
    %45 = vector.broadcast %44 : vector<1x128xf32> to vector<8x128xf32>
    %46 = arith.addf %43, %45 : vector<8x128xf32>
    %cst_38 = arith.constant 0.000000e+00 : f32
    %47 = vector.broadcast %cst_38 : f32 to vector<8x128xf32>
    %48 = arith.subf %47, %46 : vector<8x128xf32>
    %49 = math.exp %48 : vector<8x128xf32>
    %cst_39 = arith.constant 1.000000e+00 : f32
    %50 = vector.broadcast %cst_39 : f32 to vector<8x128xf32>
    %51 = arith.addf %50, %49 : vector<8x128xf32>
    %52 = tpu.reciprocal %51 {approx = true} : vector<8x128xf32> -> vector<8x128xf32>
    %cst_40 = arith.constant dense<0.000000e+00> : vector<128xf32>
    %53 = vector.multi_reduction <add>, %52, %cst_40 [0] : vector<8x128xf32> to vector<128xf32>
    %54 = vector.shape_cast %53 : vector<128xf32> to vector<1x128xf32>
    %cst_41 = arith.constant 8.000000e+00 : f32
    %55 = vector.broadcast %cst_41 : f32 to vector<1x128xf32>
    %56 = arith.divf %54, %55 : vector<1x128xf32>
    %c0_42 = arith.constant 0 : index
    %c0_43 = arith.constant 0 : index
    %57 = vector.load %arg4[%c0_42, %c0_43] : memref<1x128xf32, #tpu.memory_space<vmem>>, vector<1x128xf32>
    tpu.vector_store %arg4[%c0_42, %c0_43], %56 {strides = array<i32>} : memref<1x128xf32, #tpu.memory_space<vmem>>, vector<1x128xf32>,
    return
  }
}

</mosaic_0001>

<bundles_post_ra>
// kernel: tpu_custom_call.1
= control target key start
LH: loop header
LB: loop body
LE: loop exit
PB: predicated region body
PF: predicated region fallthrough
CT: control target
= control target key end

     0   :  { %9 = vsyncpa [#allocation5], 0  ;;  %s326_s0 = inlined_call_operand.vmem [shape: s32[8], index: 0, kind: input, shape index: {}]   ;;  %s327_s1 = inlined_call_operand.vmem [shape: f32[50,1,32], index: 1, kind: input, shape index: {}]   ;;  %s328_s2 = inlined_call_operand.vmem [shape: bf16[32,128], index: 2, kind: input, shape index: {}]   ;;  %s329_s3 = inlined_call_operand.vmem [shape: f32[1,128], index: 3, kind: input, shape index: {}]   ;;  %s330_s4 = inlined_call_operand.hbm [shape: f32[1,128], index: 4, kind: output, shape index: {}]  }
   0x1   :  { %10 = vsyncpa [#allocation4], 0  ;;  %s17_s17 = sshll.u32 %s326_s0, 4  ;;  %s18_s17 = int_to_ptr.vmem [resolvable:$true] %s17_s17 }
   0x2   :  { %s203_s18 = scalar_lea.vmem %s18_s17, 16  ;;  %p208_p1 = scmp.lt.s32.totalorder %s18_s17, %s18_s17 }
   0x3   :  { %p204_p0 = scmp.ne.s32.totalorder %s18_s17, %s203_s18  ;;  %p209_p2 = scmp.lt.s32.totalorder %s203_s18, %s203_s18 }
   0x5   :  { %p210_p3 = por %p209_p2, %p208_p1 }
   0x7   :  { %p211_p4 = pnand %p210_p3, %p204_p0 }
   0x9   :  { %214 = shalt.err (!%p211_p4)
}
   0xa   :  { %s241_s19 = smov [#allocation3]  }
   0xb   :  { %20 = dma.vmem_to_smem %s18_s17, 16, %s241_s19, [#allocation5]  }
   0xc   :  { %237 = dma.done.wait [#allocation5], 16  }
   0xd   :  { %238 = vsyncadd [#allocation5], 4294967280 }
   0xe   :  { %30 = sfence }
   0xf   :  { %v197_v0 = vld [vmem:[%s328_s2] sm:$0xff]   ;;  %v242_v1 = vmov 0.0   ;;  %v198_v2 = vld [vmem:[%s328_s2 + $0x8] sm:$0xff]   ;;  %vm243_vm0 = vmmov 0   ;;  %s32_s23 = sld [smem:[#allocation3]]  ;;  %s171_s24 = sld [smem:[#allocation3 + $0x1]] }
  0x10   :  { %185 = vmatprep.subr.bf16.mxu0 %v242_v1  ;;  %189 = vmatprep.mubr.msk.bf16.mxu0 %vm243_vm0, %v242_v1  ;;  %s172_s25 = sld [smem:[#allocation3 + $0x2]]  ;;  %s173_s26 = sld [smem:[#allocation3 + $0x3]]  ;;  %vm35_vm1 = vcmask 253952   ;;  %vm90_vm2 = vcmask 261120   ;;  %v178_v13 = vld [vmem:[%s329_s3] ss:$0 sm:$0xff] }
  0x11   :  { %186 = vmatpush3.bf16.msra.mxu0 %v197_v0  ;;  %s174_s27 = sld [smem:[#allocation3 + $0x4]]  ;;  %s175_s28 = sld [smem:[#allocation3 + $0x5]] }
  0x12   :  { %187 = vmatprep.subr.bf16.mxu0 %v242_v1  ;;  %s176_s29 = sld [smem:[#allocation3 + $0x6]]  ;;  %s177_s30 = sld [smem:[#allocation3 + $0x7]] }
  0x15   :  { %188 = vmatpush3.bf16.msra.mxu0 %v198_v2  ;;  %s33_s7 = scalar_lea.vmem %s327_s1, %s32_s23  ;;  %s38_s2 = scalar_lea.vmem %s327_s1, %s171_s24 }
  0x16   :  { %v34_v3 = vld [vmem:[%s33_s7] sm:$0x1]  ;;  %s42_s12 = scalar_lea.vmem %s327_s1, %s172_s25  ;;  %s46_s15 = scalar_lea.vmem %s327_s1, %s173_s26 }
  0x17   :  { %v39_v4 = vld [vmem:[%s38_s2] sm:$0x1]  ;;  %36 = vst.msk [vmem:[#allocation2] sm:$0x1] %vm35_vm1, %v34_v3  ;;  %s50_s18 = scalar_lea.vmem %s327_s1, %s174_s27  ;;  %s54_s21 = scalar_lea.vmem %s327_s1, %s175_s28 }
  0x18   :  { %40 = vst.msk [vmem:[#allocation2 + $0x1] sm:$0x1] %vm35_vm1, %v39_v4  ;;  %v43_v5 = vld [vmem:[%s42_s12] sm:$0x1]  ;;  %s58_s23 = scalar_lea.vmem %s327_s1, %s176_s29  ;;  %s62_s26 = scalar_lea.vmem %s327_s1, %s177_s30 }
  0x19   :  { %v47_v6 = vld [vmem:[%s46_s15] sm:$0x1]  ;;  %44 = vst.msk [vmem:[#allocation2 + $0x2] sm:$0x1] %vm35_vm1, %v43_v5  ;;  %s244_s1 = smov [#allocation6]  }
  0x1a   :  { %48 = vst.msk [vmem:[#allocation2 + $0x3] sm:$0x1] %vm35_vm1, %v47_v6  ;;  %v51_v7 = vld [vmem:[%s50_s18] sm:$0x1]  ;;  %s154_s29 = sshll.u32 %s244_s1, 4  ;;  %s155_s29 = int_to_ptr.vmem [resolvable:$true] %s154_s29 }
  0x1b   :  { %v55_v8 = vld [vmem:[%s54_s21] sm:$0x1]  ;;  %52 = vst.msk [vmem:[#allocation2 + $0x4] sm:$0x1] %vm35_vm1, %v51_v7  ;;  %s215_s3 = scalar_lea.vmem %s155_s29, 16  ;;  %s219_s30 = scalar_lea.vmem %s155_s29, 32 }
  0x1c   :  { %56 = vst.msk [vmem:[#allocation2 + $0x5] sm:$0x1] %vm35_vm1, %v55_v8  ;;  %v59_v9 = vld [vmem:[%s58_s23] sm:$0x1]  ;;  %p216_p5 = scmp.ne.s32.totalorder %s155_s29, %s215_s3  ;;  %p220_p6 = scmp.lt.s32.totalorder %s155_s29, %s155_s29 }
  0x1d   :  { %v63_v10 = vld [vmem:[%s62_s26] sm:$0x1]  ;;  %60 = vst.msk [vmem:[#allocation2 + $0x6] sm:$0x1] %vm35_vm1, %v59_v9  ;;  %p221_p7 = scmp.lt.s32.totalorder %s219_s30, %s215_s3 }
  0x1e   :  { %64 = vst.msk [vmem:[#allocation2 + $0x7] sm:$0x1] %vm35_vm1, %v63_v10 }
  0x1f   :  { %p222_p8 = por %p221_p7, %p220_p6 }
  0x21   :  { %p223_p9 = pnand %p222_p8, %p216_p5 }
  0x25   :  { %v65_v11 = vld [vmem:[#allocation2] sm:$0xff] }
  0x26   :  { %v66_v12 = vpack.c.bf16 %v65_v11, %v65_v11 }
  0x28   :  { %190 = vmatmul.mubr.msk.bf16.vlgmr.msra.gmra.mrb[0].mxu0 %vm90_vm2, %v66_v12 }
  0xfb   :  { %v128_v14 = vpop.f32.mrb[0].mxu0 }
  0xfc   :  { %v129_v15 = vadd.f32 %v178_v13, %v128_v14  ;;  %v191_v16 = vpop.f32.mrb[1].mxu0 }
  0xfd   :  { %v131_v17 = vpop.f32.mrb[2].mxu0 }
  0xfe   :  { %v134_v18 = vsub.f32 0.0, %v129_v15  ;;  %v192_v19 = vpop.f32.mrb[3].mxu0 }
 0x100   :  { %v135_v20 = vmul.f32 1.442695, %v134_v18 }
 0x102   :  { %199 = vpow2.f32 %v135_v20 }
 0x10c   :  { %v200_v21 = vpop.eup %199 }
 0x10d   :  { %v137_v22 = vadd.f32 1.0, %v200_v21 }
 0x10f   :  { %201 = vrcp.f32 %v137_v22 }
 0x119   :  { %v202_v23 = vpop.eup %201 }
 0x11a   :  { %v139_v24 = vrot.slane %v202_v23, 4 }
 0x11c   :  { %v140_v25 = vadd.f32 %v202_v23, %v139_v24 }
 0x11e   :  { %v141_v26 = vrot.slane %v140_v25, 2 }
 0x120   :  { %v142_v27 = vadd.f32 %v141_v26, %v140_v25 }
 0x122   :  { %v143_v28 = vrot.slane %v142_v27, 1 }
 0x124   :  { %v144_v29 = vadd.f32 %v143_v28, %v142_v27 }
 0x126   :  { %v146_v30 = vmul.f32 0.125, %v144_v29 }
 0x128   :  { %147 = vst [vmem:[#allocation6] sm:$0x1] %v146_v30 }
 0x129   :  { %226 = shalt.err (!%p223_p9)
}
 0x12a   :  { %s227_s7 = scalar_lea.hbm %s330_s4, 16 }
 0x12b   :  { %p228_p10 = scmp.ne.s32.totalorder %s330_s4, %s227_s7  ;;  %p231_p11 = scmp.lt.u32.totalorder %s227_s7, %s330_s4 }
 0x12d   :  { %p233_p12 = pnand %p231_p11, %p228_p10 }
 0x12f   :  { %236 = shalt.err (!%p233_p12)
}
 0x130   :  { %157 = dma.vmem_to_hbm [thread:$0]  %s155_s29, 16, %s330_s4, [#allocation4]  }
 0x131   :  { %239 = dma.done.wait [#allocation4], 16  }
 0x132   :  { %240 = vsyncadd [#allocation4], 4294967280 }
 0x133   :  { %161 = vsyncpa [#allocation4], 1 }
 0x134   :  { %162 = vsyncpa [#allocation5], 1 }

</bundles_post_ra>
